<compile_context>
chip_gen: v6e
topology: v6e:2x2x1
jax: 0.10.0
libtpu: 0.0.40
codegen_flags: <defaults>
</compile_context>

<pallas_src>
import jax
import jax.numpy as jnp
from jax.experimental import pallas as pl
from jax.experimental.pallas import tpu as pltpu


def _rational_kernel(coeffs_ref, x_ref, o_ref):
    # coeffs_ref: (8,) f32 in SMEM, row-major flatten of the (4, 2) parameter:
    #   [c00, c01, c10, c11, c20, c21, c30, c31]   (c01 is ignored -> zeroed)
    # x_ref / o_ref: (tile_rows, 128) VMEM tiles.
    x = x_ref[...].astype(jnp.float32)

    c00 = coeffs_ref[0]
    c10 = coeffs_ref[2]
    c20 = coeffs_ref[4]
    c30 = coeffs_ref[6]
    c11 = coeffs_ref[3]
    c21 = coeffs_ref[5]
    c31 = coeffs_ref[7]

    # Numerator P(x) via Horner.
    p = ((c00 * x + c10) * x + c20) * x + c30
    # Denominator Q(x): cubic coefficient is forcibly zero in the torch forward,
    # so evaluate only the quadratic (dead 0*x^3 term removed).
    q = (c11 * x + c21) * x + c31

    # Divide on the EUP: approximate reciprocal + one Newton-Raphson refinement.
    r = pl.reciprocal(q, approx=True)
    r = r * (2.0 - q * r)

    o_ref[...] = (p * r).astype(o_ref.dtype)


def rational_forward(x: jax.Array, coeffs: jax.Array) -> jax.Array:
    """Apply the Rational activation elementwise. x: any shape, coeffs: (4, 2)."""
    orig_shape = x.shape
    orig_dtype = x.dtype

    flat = x.reshape(-1)
    n = flat.shape[0]
    lanes = 128

    # Pad only to the next 128-lane boundary (no-op when n % 128 == 0, as in the
    # test shape).  Pad value 1.0 keeps Q(pad) well away from zero; padded lanes
    # are sliced off afterwards anyway.
    n_pad = (-n) % lanes
    if n_pad:
        flat = jnp.concatenate([flat, jnp.ones((n_pad,), dtype=flat.dtype)])
    rows = flat.shape[0] // lanes
    x2d = flat.reshape(rows, lanes)

    # Large blocks: up to 1024 rows (512 KiB f32 per buffer).  When rows <= 1024
    # the single block equals the full array extent (satisfies the (8,128)/full
    # extent rule and gives one grid step for the small test input); for big
    # inputs the block is a multiple of 8 rows and the ragged tail is handled
    # by the cdiv grid.
    tile_rows = min(rows, 1024)
    grid = (pl.cdiv(rows, tile_rows),)

    coeffs_flat = coeffs.reshape(-1).astype(jnp.float32)  # (8,) -> SMEM scalars

    out2d = pl.pallas_call(
        _rational_kernel,
        out_shape=jax.ShapeDtypeStruct((rows, lanes), orig_dtype),
        grid_spec=pltpu.PrefetchScalarGridSpec(
            num_scalar_prefetch=0,
            grid=grid,
            in_specs=[
                # Coefficients: whole (8,) array in SMEM, read as scalars.
                pl.BlockSpec(memory_space=pltpu.MemorySpace.SMEM),
                # Input tile: (tile_rows, 128), lane-dense.
                pl.BlockSpec((tile_rows, lanes), lambda i: (i, 0)),
            ],
            out_specs=pl.BlockSpec((tile_rows, lanes), lambda i: (i, 0)),
        ),
        compiler_params=pltpu.CompilerParams(
            dimension_semantics=("parallel",),  # lets v7x shard blocks over 2 TCs
        ),
    )(coeffs_flat, x2d)

    out_flat = out2d.reshape(-1)
    if n_pad:
        out_flat = out_flat[:n]
    return out_flat.reshape(orig_shape)


def rational_reference(x: jax.Array, coeffs: jax.Array) -> jax.Array:
    """Pure-JAX reference mirroring the torch forward exactly."""
    c = coeffs.at[0, 1].set(0.0)
    exp = jnp.array([3.0, 2.0, 1.0, 0.0], dtype=x.dtype)
    X = jnp.power(x[..., None], exp)          # (..., 4)
    PQ = X @ c.astype(x.dtype)                # (..., 2)
    return PQ[..., 0] / PQ[..., 1]


if __name__ == "__main__":
    # Deterministic parameter init (matches reset_parameters()).
    coeffs = jnp.array(
        [[1.1915, 0.0],
         [1.5957, 2.383],
         [0.5,    0.0],
         [0.0218, 1.0]],
        dtype=jnp.float32,
    )

    key = jax.random.PRNGKey(0)
    x = jax.random.normal(key, (2, 4, 16, 16), dtype=jnp.float32)  # NCHW

    out = rational_forward(x, coeffs)
    out = jax.block_until_ready(out)

    ref = rational_reference(x, coeffs)
    assert out.shape == x.shape and out.dtype == x.dtype
    assert jnp.allclose(out, ref, atol=1e-5, rtol=1e-5), "mismatch vs reference"

    print("KERNEL_OK")
</pallas_src>

<mosaic_0001>
module attributes {stable_mosaic.version = 11 : i64} {
  func.func @_rational_kernel(%arg0: i32, %arg1: memref<8xf32, #tpu.memory_space<smem>>, %arg2: memref<16x128xf32, #tpu.memory_space<vmem>>, %arg3: memref<16x128xf32, #tpu.memory_space<vmem>>) attributes {dimension_semantics = [#tpu.dimension_semantics<parallel>], iteration_bounds = array<i64: 1>, scalar_prefetch = 0 : i64, scratch_operands = 0 : i64, tpu.core_type = #tpu.core_type<tc>, window_params = [{transform_indices = @transform_0, window_bounds = array<i64: 8>}, {transform_indices = @transform_1, window_bounds = array<i64: 16, 128>}, {transform_indices = @transform_2, window_bounds = array<i64: 16, 128>}]} {
    %c0 = arith.constant 0 : index
    %c0_0 = arith.constant 0 : index
    %0 = vector.load %arg2[%c0, %c0_0] : memref<16x128xf32, #tpu.memory_space<vmem>>, vector<16x128xf32>
    %c0_1 = arith.constant 0 : index
    %1 = memref.load %arg1[%c0_1] : memref<8xf32, #tpu.memory_space<smem>>
    %c2 = arith.constant 2 : index
    %2 = memref.load %arg1[%c2] : memref<8xf32, #tpu.memory_space<smem>>
    %c4 = arith.constant 4 : index
    %3 = memref.load %arg1[%c4] : memref<8xf32, #tpu.memory_space<smem>>
    %c6 = arith.constant 6 : index
    %4 = memref.load %arg1[%c6] : memref<8xf32, #tpu.memory_space<smem>>
    %c3 = arith.constant 3 : index
    %5 = memref.load %arg1[%c3] : memref<8xf32, #tpu.memory_space<smem>>
    %c5 = arith.constant 5 : index
    %6 = memref.load %arg1[%c5] : memref<8xf32, #tpu.memory_space<smem>>
    %c7 = arith.constant 7 : index
    %7 = memref.load %arg1[%c7] : memref<8xf32, #tpu.memory_space<smem>>
    %8 = vector.broadcast %1 : f32 to vector<16x128xf32>
    %9 = arith.mulf %8, %0 : vector<16x128xf32>
    %10 = vector.broadcast %2 : f32 to vector<16x128xf32>
    %11 = arith.addf %9, %10 : vector<16x128xf32>
    %12 = arith.mulf %11, %0 : vector<16x128xf32>
    %13 = vector.broadcast %3 : f32 to vector<16x128xf32>
    %14 = arith.addf %12, %13 : vector<16x128xf32>
    %15 = arith.mulf %14, %0 : vector<16x128xf32>
    %16 = vector.broadcast %4 : f32 to vector<16x128xf32>
    %17 = arith.addf %15, %16 : vector<16x128xf32>
    %18 = vector.broadcast %5 : f32 to vector<16x128xf32>
    %19 = arith.mulf %18, %0 : vector<16x128xf32>
    %20 = vector.broadcast %6 : f32 to vector<16x128xf32>
    %21 = arith.addf %19, %20 : vector<16x128xf32>
    %22 = arith.mulf %21, %0 : vector<16x128xf32>
    %23 = vector.broadcast %7 : f32 to vector<16x128xf32>
    %24 = arith.addf %22, %23 : vector<16x128xf32>
    %25 = tpu.reciprocal %24 {approx = true} : vector<16x128xf32> -> vector<16x128xf32>
    %26 = arith.mulf %24, %25 : vector<16x128xf32>
    %cst = arith.constant 2.000000e+00 : f32
    %27 = vector.broadcast %cst : f32 to vector<16x128xf32>
    %28 = arith.subf %27, %26 : vector<16x128xf32>
    %29 = arith.mulf %25, %28 : vector<16x128xf32>
    %30 = arith.mulf %17, %29 : vector<16x128xf32>
    %c0_2 = arith.constant 0 : index
    %c0_3 = arith.constant 0 : index
    %31 = vector.load %arg3[%c0_2, %c0_3] : memref<16x128xf32, #tpu.memory_space<vmem>>, vector<16x128xf32>
    tpu.vector_store %arg3[%c0_2, %c0_3], %30 {strides = array<i32>} : memref<16x128xf32, #tpu.memory_space<vmem>>, vector<16x128xf32>,
    return
  }
  func.func @transform_0(%arg0: i32) -> i32 {
    %c0_i32 = arith.constant 0 : i32
    %c0_i32_0 = arith.constant 0 : i32
    return %c0_i32 : i32
  }
  func.func @transform_1(%arg0: i32) -> (i32, i32) {
    %c0_i32 = arith.constant 0 : i32
    %c0_i32_0 = arith.constant 0 : i32
    return %arg0, %c0_i32 : i32, i32
  }
  func.func @transform_2(%arg0: i32) -> (i32, i32) {
    %c0_i32 = arith.constant 0 : i32
    %c0_i32_0 = arith.constant 0 : i32
    return %arg0, %c0_i32 : i32, i32
  }
}

</mosaic_0001>

<bundles_post_ra>
// kernel: tpu_custom_call.1
= control target key start
LH: loop header
LB: loop body
LE: loop exit
PB: predicated region body
PF: predicated region fallthrough
CT: control target
= control target key end

     0   :  { %7 = vsyncpa [#allocation5], 0  ;;  %s207_s0 = inlined_call_operand.hbm [shape: f32[8], index: 0, kind: input, shape index: {}]   ;;  %s208_s1 = inlined_call_operand.hbm [shape: f32[16,128], index: 1, kind: input, shape index: {}]   ;;  %s209_s2 = inlined_call_operand.hbm [shape: f32[16,128], index: 2, kind: output, shape index: {}]  }
   0x1   :  { %8 = vsyncpa [#allocation3], 0 }
   0x2   :  { %9 = vsyncpa [#allocation4], 0  ;;  %s172_s9 = smov [#allocation2]   ;;  %s173_s12 = smov [#allocation6]  }
   0x3   :  { %17 = dma.hbm_to_smem %s207_s0, 16, %s172_s9, [#allocation5]  }
   0x4   :  { %s23_s13 = sshll.u32 %s173_s12, 4  ;;  %s24_s13 = int_to_ptr.vmem [resolvable:$true] %s23_s13 }
   0x5   :  { %s134_s14 = scalar_lea.vmem %s24_s13, 256  ;;  %p139_p1 = scmp.lt.s32.totalorder %s24_s13, %s24_s13 }
   0x6   :  { %p135_p0 = scmp.ne.s32.totalorder %s24_s13, %s134_s14  ;;  %p140_p2 = scmp.lt.s32.totalorder %s134_s14, %s134_s14 }
   0x8   :  { %p141_p3 = por %p140_p2, %p139_p1 }
   0xa   :  { %p142_p4 = pnand %p141_p3, %p135_p0 }
   0xc   :  { %145 = shalt.err (!%p142_p4)
}
   0xd   :  { %s174_s15 = smov 128   ;;  %s175_s16 = smov 8  }
   0xe   :  { %29 = dma.hbm_to_vmem [thread:$0]  %s208_s1, 256, %s24_s13, [#allocation3], %s174_s15, %s174_s15, %s175_s16  }
   0xf   :  { %166 = dma.done.wait [#allocation5], 16  }
  0x10   :  { %167 = vsyncadd [#allocation5], 4294967280 }
  0x11   :  { %168 = dma.done.wait [#allocation3], 256  }
  0x12   :  { %169 = vsyncadd [#allocation3], 4294967040 }
  0x13   :  { %36 = sfence }
  0x14   :  { %s39_s0 = sld [smem:[#allocation2]]  ;;  %v37_v0 = vld [vmem:[#allocation6] sm:$0xff]  ;;  %v38_v1 = vld [vmem:[#allocation6 + $0x8] sm:$0xff]  ;;  %s176_s24 = smov [#allocation7]  }
  0x15   :  { %s106_s19 = sld [smem:[#allocation2 + $0x3]]  ;;  %s90_s25 = sshll.u32 %s176_s24, 4  ;;  %s91_s25 = int_to_ptr.vmem [resolvable:$true] %s90_s25 }
  0x16   :  { %s107_s20 = sld [smem:[#allocation2 + $0x5]]  ;;  %s146_s26 = scalar_lea.vmem %s91_s25, 256 }
  0x17   :  { %s108_s21 = sld [smem:[#allocation2 + $0x7]]  ;;  %p147_p5 = scmp.ne.s32.totalorder %s91_s25, %s146_s26 }
  0x18   :  { %s103_s22 = sld [smem:[#allocation2 + $0x2]]  ;;  %p151_p6 = scmp.lt.s32.totalorder %s91_s25, %s91_s25 }
  0x19   :  { %s104_s1 = sld [smem:[#allocation2 + $0x4]]  ;;  %p152_p7 = scmp.lt.s32.totalorder %s146_s26, %s146_s26 }
  0x1a   :  { %v46_v5 = vstv %s39_s0  ;;  %s105_s23 = sld [smem:[#allocation2 + $0x6]] }
  0x1b   :  { %v62_v2 = vstv %s106_s19  ;;  %v47_v10 = vmul.f32 %v46_v5, %v37_v0  ;;  %v48_v13 = vmul.f32 %v46_v5, %v38_v1  ;;  %p153_p8 = por %p152_p7, %p151_p6 }
  0x1c   :  { %v63_v3 = vmul.f32 %v62_v2, %v37_v0  ;;  %v65_v4 = vstv %s107_s20  ;;  %v64_v6 = vmul.f32 %v62_v2, %v38_v1 }
  0x1d   :  { %v70_v8 = vstv %s108_s21  ;;  %p154_p9 = pnand %p153_p8, %p147_p5 }
  0x1e   :  { %v66_v7 = vadd.f32 %v65_v4, %v63_v3  ;;  %v67_v9 = vadd.f32 %v65_v4, %v64_v6  ;;  %v49_v12 = vstv %s103_s22 }
  0x1f   :  { %v50_v17 = vadd.f32 %v49_v12, %v47_v10  ;;  %v51_v18 = vadd.f32 %v49_v12, %v48_v13  ;;  %v54_v20 = vstv %s104_s1 }
  0x20   :  { %v68_v11 = vmul.f32 %v66_v7, %v37_v0  ;;  %v69_v14 = vmul.f32 %v67_v9, %v38_v1  ;;  %v59_v26 = vstv %s105_s23 }
  0x21   :  { %v52_v19 = vmul.f32 %v50_v17, %v37_v0  ;;  %v53_v21 = vmul.f32 %v51_v18, %v38_v1 }
  0x22   :  { %v71_v15 = vadd.f32 %v70_v8, %v68_v11  ;;  %v72_v16 = vadd.f32 %v70_v8, %v69_v14 }
  0x23   :  { %v55_v22 = vadd.f32 %v54_v20, %v52_v19  ;;  %v56_v23 = vadd.f32 %v54_v20, %v53_v21 }
  0x24   :  { %114 = vrcp.f32 %v71_v15 }
  0x25   :  { %116 = vrcp.f32 %v72_v16  ;;  %v57_v24 = vmul.f32 %v55_v22, %v37_v0  ;;  %v58_v27 = vmul.f32 %v56_v23, %v38_v1 }
  0x27   :  { %v60_v31 = vadd.f32 %v59_v26, %v57_v24  ;;  %v61_v33 = vadd.f32 %v59_v26, %v58_v27 }
  0x31   :  { %v115_v25 = vpop.eup %114 }
  0x32   :  { %v117_v28 = vpop.eup %116  ;;  %v75_v29 = vmul.f32 %v115_v25, %v71_v15 }
  0x33   :  { %v76_v30 = vmul.f32 %v117_v28, %v72_v16 }
  0x34   :  { %v77_v32 = vsub.f32 2.0, %v75_v29 }
  0x35   :  { %v78_v34 = vsub.f32 2.0, %v76_v30 }
  0x36   :  { %v79_v35 = vmul.f32 %v115_v25, %v77_v32 }
  0x37   :  { %v80_v36 = vmul.f32 %v117_v28, %v78_v34 }
  0x38   :  { %v81_v37 = vmul.f32 %v79_v35, %v60_v31 }
  0x39   :  { %v82_v38 = vmul.f32 %v80_v36, %v61_v33 }
  0x3a   :  { %83 = vst [vmem:[#allocation7] sm:$0xff] %v81_v37 }
  0x3b   :  { %84 = vst [vmem:[#allocation7 + $0x8] sm:$0xff] %v82_v38 }
  0x3c   :  { %157 = shalt.err (!%p154_p9)
}
  0x3d   :  { %96 = dma.vmem_to_hbm [thread:$0]  %s91_s25, 256, %s209_s2, [#allocation4], %s174_s15, %s174_s15, %s175_s16  }
  0x3e   :  { %170 = dma.done.wait [#allocation4], 256  }
  0x3f   :  { %171 = vsyncadd [#allocation4], 4294967040 }
  0x40   :  { %100 = vsyncpa [#allocation3], 1 }
  0x41   :  { %101 = vsyncpa [#allocation4], 1 }
  0x42   :  { %102 = vsyncpa [#allocation5], 1 }

</bundles_post_ra>
